<compile_context>
chip_gen: v7x
topology: tpu7x:2x2x1
jax: 0.10.0
libtpu: 0.0.40
codegen_flags: <defaults>
</compile_context>

<pallas_src>
import functools

import jax
import jax.numpy as jnp
import numpy as np
from jax.experimental import pallas as pl
from jax.experimental.pallas import tpu as pltpu

NEG_MASK = -9e15  # -9000000000000000.0, matches the PyTorch constant


def _local_agg_kernel(hq_ref, hk_ref, adj_ref, a_ref, out_ref, *, leaky_alpha):
    # hq_ref : (Bt, TQ, Dp)  query rows for this tile
    # hk_ref : (Bt, N,  Dp)  full key/value rows (resident across query tiles)
    # adj_ref: (Bt, TQ, N)   int8 edge types in {0..4}
    # a_ref  : (4, Dp)       stacked [a_0; a_1; a_2; a_3]
    # out_ref: (Bt, TQ, Dp)
    hq = hq_ref[...].astype(jnp.float32)            # (Bt, TQ, Dp)
    a = a_ref[...].astype(jnp.float32)              # (4, Dp)
    adj = adj_ref[...].astype(jnp.int32)            # (Bt, TQ, N)
    hk_bf = hk_ref[...].astype(jnp.bfloat16)        # (Bt, N, Dp)

    bt, tq, _ = hq.shape
    n = adj.shape[-1]

    # Fused logits: scale the query rows by all four attention vectors and do a
    # single batched MXU matmul (bf16 in, f32 accumulate).
    hq4 = jnp.concatenate(
        [hq * a[k][None, None, :] for k in range(4)], axis=1
    )                                                # (Bt, 4*TQ, Dp), f32
    e4 = jnp.einsum(
        "bqd,bkd->bqk",
        hq4.astype(jnp.bfloat16),
        hk_bf,
        preferred_element_type=jnp.float32,
    )                                                # (Bt, 4*TQ, N)

    # Fold the adjacency masks into one running alpha (low live-buffer count),
    # then apply LeakyReLU once on the selected (TQ, N) buffer.  Equivalent to
    # the PyTorch leakyrelu-then-select order under the softmax (see header).
    alpha = jnp.full((bt, tq, n), NEG_MASK, dtype=jnp.float32)
    for k in range(4):
        ek = e4[:, k * tq:(k + 1) * tq, :]           # static slice
        alpha = jnp.where(adj == (k + 1), ek, alpha)
    alpha = jnp.where(alpha > 0, alpha, leaky_alpha * alpha)

    # Exact row softmax (full key dimension is resident in this step).
    m = jnp.max(alpha, axis=-1, keepdims=True)
    p = jnp.exp(alpha - m)                           # (Bt, TQ, N), f32
    s = jnp.sum(p, axis=-1, keepdims=True)           # (Bt, TQ, 1)

    # Weighted sum first, then normalize the (TQ, Dp) result (cheaper than
    # normalizing the (TQ, N) weights); reciprocal goes to the EUP slot.
    out = jnp.einsum(
        "bqk,bkd->bqd",
        p.astype(jnp.bfloat16),
        hk_bf,
        preferred_element_type=jnp.float32,
    )                                                # (Bt, TQ, Dp)
    out = out * pl.reciprocal(s, approx=True)
    out_ref[...] = out.astype(out_ref.dtype)


def _pick_tq(n):
    """Query-tile size: full N when small, else a multiple-of-8 divisor <=256."""
    if n <= 256:
        return n
    for tq in range(256, 0, -8):
        if n % tq == 0:
            return tq
    return n


def _pick_bt(b, tq, n, dp, budget_bytes):
    """Largest divisor of B whose per-step VMEM footprint fits the budget."""
    def per_step_bytes(bt):
        f32 = 4
        # double-buffered hq/hk/out blocks + int8 adj blocks
        blocks = 2 * bt * (2 * tq * dp + n * dp) * f32 + 2 * bt * tq * n
        # fused logits + alpha/p + f32 output accumulator
        interm = bt * (4 * tq * n + 2 * tq * n + 2 * tq * dp) * f32
        return blocks + interm

    best = 1
    for bt in range(1, b + 1):
        if b % bt == 0 and per_step_bytes(bt) <= budget_bytes:
            best = bt
    return best


def local_aggregator(hidden, adj, a_params, leaky_alpha):
    """hidden: (B, N, D) f32, adj: (B, N, N) int edge types {0..4},
    a_params: (4, D) f32 (rows are a_0..a_3).  Returns (B, N, D)."""
    B, N, D = hidden.shape

    # Lane-densify the feature dim (zero-pad D to a multiple of 128) so the
    # hidden/output tiles use full-width, unmasked vector stores.  Zero-padded
    # a_k entries keep the logits unchanged; padded output columns are sliced.
    Dp = ((D + 127) // 128) * 128
    if Dp != D:
        hidden_p = jnp.pad(hidden, ((0, 0), (0, 0), (0, Dp - D)))
        a_p = jnp.pad(a_params, ((0, 0), (0, Dp - D)))
    else:
        hidden_p, a_p = hidden, a_params

    # Quarter the dominant HBM stream at large N: edge types fit in int8.
    adj8 = adj.astype(jnp.int8)

    TQ = _pick_tq(N)
    num_q = N // TQ
    Bt = _pick_bt(B, TQ, N, Dp, budget_bytes=20 * 1024 * 1024)
    if num_q == 1 and B > 1:
        # Keep >=2 grid steps so both v7x TensorCores get work.
        Bt = min(Bt, max(1, B // 2))
    while B % Bt:
        Bt -= 1
    grid = (B // Bt, num_q)

    kernel = functools.partial(_local_agg_kernel, leaky_alpha=float(leaky_alpha))
    out = pl.pallas_call(
        kernel,
        out_shape=jax.ShapeDtypeStruct((B, N, Dp), hidden.dtype),
        grid_spec=pltpu.PrefetchScalarGridSpec(
            num_scalar_prefetch=0,
            grid=grid,
            in_specs=[
                pl.BlockSpec((Bt, TQ, Dp), lambda b, q: (b, q, 0)),  # query rows
                pl.BlockSpec((Bt, N, Dp), lambda b, q: (b, 0, 0)),   # full keys/values
                pl.BlockSpec((Bt, TQ, N), lambda b, q: (b, q, 0)),   # adjacency (int8)
                pl.BlockSpec((4, Dp), lambda b, q: (0, 0)),          # a_0..a_3
            ],
            out_specs=pl.BlockSpec((Bt, TQ, Dp), lambda b, q: (b, q, 0)),
        ),
        compiler_params=pltpu.CompilerParams(
            dimension_semantics=("parallel", "parallel"),
            vmem_limit_bytes=48 * 1024 * 1024,  # fits v7x's 64 MiB physical VMEM
        ),
    )(hidden_p, hidden_p, adj8, a_p)

    return out[..., :D] if Dp != D else out


def local_aggregator_ref(hidden, adj, a_params, leaky_alpha):
    """Pure-JAX f32 reference mirroring the PyTorch forward."""
    h = hidden
    a_input = h[:, :, None, :] * h[:, None, :, :]          # (B, N, N, D)

    def lrelu(x):
        return jnp.where(x > 0, x, leaky_alpha * x)

    e = [lrelu(jnp.einsum("bijd,d->bij", a_input, a_params[k])) for k in range(4)]
    neg = jnp.full_like(e[0], NEG_MASK)
    alpha = jnp.where(adj == 1, e[0], neg)
    alpha = jnp.where(adj == 2, e[1], alpha)
    alpha = jnp.where(adj == 3, e[2], alpha)
    alpha = jnp.where(adj == 4, e[3], alpha)
    alpha = jax.nn.softmax(alpha, axis=-1)
    return jnp.einsum("bij,bjd->bid", alpha, h)


if __name__ == "__main__":
    B, N, D = 2, 8, 32
    leaky_alpha = 0.2

    key = jax.random.PRNGKey(0)
    k_h, k_a, k_adj, k_bias = jax.random.split(key, 4)

    hidden = jax.random.normal(k_h, (B, N, D), dtype=jnp.float32)
    # Parameters a_0..a_3, each (D, 1) in torch; stacked here as (4, D).
    a_params = jax.random.normal(k_a, (4, D), dtype=jnp.float32) * 0.1
    # bias (D,) exists in the module but is unused in forward.
    _bias = jax.random.normal(k_bias, (D,), dtype=jnp.float32)  # noqa: F841
    # Adjacency with edge types 0..4 (0 => masked out).
    adj = jax.random.randint(k_adj, (B, N, N), 0, 5, dtype=jnp.int32)

    out = local_aggregator(hidden, adj, a_params, leaky_alpha)
    out = jax.block_until_ready(out)

    ref = jax.block_until_ready(
        local_aggregator_ref(hidden, adj, a_params, leaky_alpha)
    )
    # bf16 MXU inputs + approx reciprocal => looser tolerance vs the f32 ref.
    np.testing.assert_allclose(np.asarray(out), np.asarray(ref), rtol=3e-2, atol=3e-2)

    print("KERNEL_OK")
</pallas_src>

<mosaic_0001>
module attributes {stable_mosaic.version = 11 : i64} {
  func.func @_local_agg_kernel(%arg0: i32, %arg1: i32, %arg2: memref<1x8x128xf32, #tpu.memory_space<vmem>>, %arg3: memref<1x8x128xf32, #tpu.memory_space<vmem>>, %arg4: memref<1x8x8xi8, #tpu.memory_space<vmem>>, %arg5: memref<4x128xf32, #tpu.memory_space<vmem>>, %arg6: memref<1x8x128xf32, #tpu.memory_space<vmem>>) attributes {dimension_semantics = [#tpu.dimension_semantics<parallel>, #tpu.dimension_semantics<parallel>], iteration_bounds = array<i64: 2, 1>, scalar_prefetch = 0 : i64, scratch_operands = 0 : i64, tpu.core_type = #tpu.core_type<tc>, window_params = [{transform_indices = @transform_0, window_bounds = array<i64: 1, 8, 128>}, {transform_indices = @transform_1, window_bounds = array<i64: 1, 8, 128>}, {transform_indices = @transform_2, window_bounds = array<i64: 1, 8, 8>}, {pipeline_mode = #tpu.pipeline_mode<synchronous>, transform_indices = @transform_3, window_bounds = array<i64: 4, 128>}, {transform_indices = @transform_4, window_bounds = array<i64: 1, 8, 128>}]} {
    %c0 = arith.constant 0 : index
    %c0_0 = arith.constant 0 : index
    %c0_1 = arith.constant 0 : index
    %0 = vector.load %arg2[%c0, %c0_0, %c0_1] : memref<1x8x128xf32, #tpu.memory_space<vmem>>, vector<1x8x128xf32>
    %c0_2 = arith.constant 0 : index
    %c0_3 = arith.constant 0 : index
    %1 = vector.load %arg5[%c0_2, %c0_3] : memref<4x128xf32, #tpu.memory_space<vmem>>, vector<4x128xf32>
    %c0_4 = arith.constant 0 : index
    %c0_5 = arith.constant 0 : index
    %c0_6 = arith.constant 0 : index
    %2 = vector.load %arg4[%c0_4, %c0_5, %c0_6] : memref<1x8x8xi8, #tpu.memory_space<vmem>>, vector<1x8x8xi8>
    %3 = arith.extsi %2 : vector<1x8x8xi8> to vector<1x8x8xi32>
    %c0_7 = arith.constant 0 : index
    %c0_8 = arith.constant 0 : index
    %c0_9 = arith.constant 0 : index
    %4 = vector.load %arg3[%c0_7, %c0_8, %c0_9] : memref<1x8x128xf32, #tpu.memory_space<vmem>>, vector<1x8x128xf32>
    %5 = arith.truncf %4 : vector<1x8x128xf32> to vector<1x8x128xbf16>
    %6 = vector.extract_strided_slice %1 {offsets = [0, 0], sizes = [1, 128], strides = [1, 1]} : vector<4x128xf32> to vector<1x128xf32>
    %7 = vector.shape_cast %6 : vector<1x128xf32> to vector<128xf32>
    %8 = vector.shape_cast %7 : vector<128xf32> to vector<1x1x128xf32>
    %9 = vector.broadcast %8 : vector<1x1x128xf32> to vector<1x8x128xf32>
    %10 = arith.mulf %0, %9 : vector<1x8x128xf32>
    %11 = vector.extract_strided_slice %1 {offsets = [1, 0], sizes = [1, 128], strides = [1, 1]} : vector<4x128xf32> to vector<1x128xf32>
    %12 = vector.shape_cast %11 : vector<1x128xf32> to vector<128xf32>
    %13 = vector.shape_cast %12 : vector<128xf32> to vector<1x1x128xf32>
    %14 = vector.broadcast %13 : vector<1x1x128xf32> to vector<1x8x128xf32>
    %15 = arith.mulf %0, %14 : vector<1x8x128xf32>
    %16 = vector.extract_strided_slice %1 {offsets = [2, 0], sizes = [1, 128], strides = [1, 1]} : vector<4x128xf32> to vector<1x128xf32>
    %17 = vector.shape_cast %16 : vector<1x128xf32> to vector<128xf32>
    %18 = vector.shape_cast %17 : vector<128xf32> to vector<1x1x128xf32>
    %19 = vector.broadcast %18 : vector<1x1x128xf32> to vector<1x8x128xf32>
    %20 = arith.mulf %0, %19 : vector<1x8x128xf32>
    %21 = vector.extract_strided_slice %1 {offsets = [3, 0], sizes = [1, 128], strides = [1, 1]} : vector<4x128xf32> to vector<1x128xf32>
    %22 = vector.shape_cast %21 : vector<1x128xf32> to vector<128xf32>
    %23 = vector.shape_cast %22 : vector<128xf32> to vector<1x1x128xf32>
    %24 = vector.broadcast %23 : vector<1x1x128xf32> to vector<1x8x128xf32>
    %25 = arith.mulf %0, %24 : vector<1x8x128xf32>
    %26 = tpu.concatenate %10, %15, %20, %25 in 1 : vector<1x8x128xf32>, vector<1x8x128xf32>, vector<1x8x128xf32>, vector<1x8x128xf32> -> vector<1x32x128xf32>
    %27 = arith.truncf %26 : vector<1x32x128xf32> to vector<1x32x128xbf16>
    "tpu.trace_start"() <{level = 10 : i32, message = "bqd,bkd->bqk"}> : () -> ()
    %cst = arith.constant dense<0.000000e+00> : vector<1x32x8xf32>
    %28 = tpu.matmul %27, %5, %cst {dimension_numbers = #tpu.dot_dimension_numbers<[2], [2], [1], [1], [0, 0, 0, 1, 1, 1], [0], [0]>} : vector<1x32x128xbf16>, vector<1x8x128xbf16>, vector<1x32x8xf32> -> vector<1x32x8xf32>
    %cst_10 = arith.constant -9.000000e+15 : f32
    "tpu.trace_stop"() : () -> ()
    %29 = vector.broadcast %cst_10 : f32 to vector<1x8x8xf32>
    %30 = vector.extract_strided_slice %28 {offsets = [0, 0, 0], sizes = [1, 8, 8], strides = [1, 1, 1]} : vector<1x32x8xf32> to vector<1x8x8xf32>
    %c1_i32 = arith.constant 1 : i32
    %31 = vector.broadcast %c1_i32 : i32 to vector<1x8x8xi32>
    %32 = arith.cmpi eq, %3, %31 : vector<1x8x8xi32>
    %33 = arith.select %32, %30, %29 : vector<1x8x8xi1>, vector<1x8x8xf32>
    %34 = vector.extract_strided_slice %28 {offsets = [0, 8, 0], sizes = [1, 8, 8], strides = [1, 1, 1]} : vector<1x32x8xf32> to vector<1x8x8xf32>
    %c2_i32 = arith.constant 2 : i32
    %35 = vector.broadcast %c2_i32 : i32 to vector<1x8x8xi32>
    %36 = arith.cmpi eq, %3, %35 : vector<1x8x8xi32>
    %37 = arith.select %36, %34, %33 : vector<1x8x8xi1>, vector<1x8x8xf32>
    %38 = vector.extract_strided_slice %28 {offsets = [0, 16, 0], sizes = [1, 8, 8], strides = [1, 1, 1]} : vector<1x32x8xf32> to vector<1x8x8xf32>
    %c3_i32 = arith.constant 3 : i32
    %39 = vector.broadcast %c3_i32 : i32 to vector<1x8x8xi32>
    %40 = arith.cmpi eq, %3, %39 : vector<1x8x8xi32>
    %41 = arith.select %40, %38, %37 : vector<1x8x8xi1>, vector<1x8x8xf32>
    %42 = vector.extract_strided_slice %28 {offsets = [0, 24, 0], sizes = [1, 8, 8], strides = [1, 1, 1]} : vector<1x32x8xf32> to vector<1x8x8xf32>
    %c4_i32 = arith.constant 4 : i32
    %43 = vector.broadcast %c4_i32 : i32 to vector<1x8x8xi32>
    %44 = arith.cmpi eq, %3, %43 : vector<1x8x8xi32>
    %45 = arith.select %44, %42, %41 : vector<1x8x8xi1>, vector<1x8x8xf32>
    %cst_11 = arith.constant 0.000000e+00 : f32
    %46 = vector.broadcast %cst_11 : f32 to vector<1x8x8xf32>
    %47 = arith.cmpf ogt, %45, %46 : vector<1x8x8xf32>
    %cst_12 = arith.constant 2.000000e-01 : f32
    %48 = vector.broadcast %cst_12 : f32 to vector<1x8x8xf32>
    %49 = arith.mulf %48, %45 : vector<1x8x8xf32>
    %50 = arith.select %47, %45, %49 : vector<1x8x8xi1>, vector<1x8x8xf32>
    %cst_13 = arith.constant dense<0xFF800000> : vector<1x8xf32>
    %51 = vector.multi_reduction <maximumf>, %50, %cst_13 [2] : vector<1x8x8xf32> to vector<1x8xf32>
    %52 = vector.shape_cast %51 : vector<1x8xf32> to vector<1x8x1xf32>
    %53 = vector.broadcast %52 : vector<1x8x1xf32> to vector<1x8x8xf32>
    %54 = arith.subf %50, %53 : vector<1x8x8xf32>
    %55 = math.exp %54 : vector<1x8x8xf32>
    %cst_14 = arith.constant dense<0.000000e+00> : vector<1x8xf32>
    %56 = vector.multi_reduction <add>, %55, %cst_14 [2] : vector<1x8x8xf32> to vector<1x8xf32>
    %57 = vector.shape_cast %56 : vector<1x8xf32> to vector<1x8x1xf32>
    %58 = arith.truncf %55 : vector<1x8x8xf32> to vector<1x8x8xbf16>
    "tpu.trace_start"() <{level = 10 : i32, message = "bqk,bkd->bqd"}> : () -> ()
    %cst_15 = arith.constant dense<0.000000e+00> : vector<1x8x128xf32>
    %59 = tpu.matmul %58, %5, %cst_15 {dimension_numbers = #tpu.dot_dimension_numbers<[2], [1], [1], [2], [0, 0, 0, 1, 1, 2], [0], [0]>} : vector<1x8x8xbf16>, vector<1x8x128xbf16>, vector<1x8x128xf32> -> vector<1x8x128xf32>
    "tpu.trace_stop"() : () -> ()
    %60 = tpu.reciprocal %57 {approx = true} : vector<1x8x1xf32> -> vector<1x8x1xf32>
    %61 = vector.broadcast %60 : vector<1x8x1xf32> to vector<1x8x128xf32>
    %62 = arith.mulf %59, %61 : vector<1x8x128xf32>
    %c0_16 = arith.constant 0 : index
    %c0_17 = arith.constant 0 : index
    %c0_18 = arith.constant 0 : index
    %63 = vector.load %arg6[%c0_16, %c0_17, %c0_18] : memref<1x8x128xf32, #tpu.memory_space<vmem>>, vector<1x8x128xf32>
    tpu.vector_store %arg6[%c0_16, %c0_17, %c0_18], %62 {strides = array<i32>} : memref<1x8x128xf32, #tpu.memory_space<vmem>>, vector<1x8x128xf32>,
    return
  }
  func.func @transform_0(%arg0: i32, %arg1: i32) -> (i32, i32, i32) {
    %c0_i32 = arith.constant 0 : i32
    %c0_i32_0 = arith.constant 0 : i32
    return %arg0, %arg1, %c0_i32 : i32, i32, i32
  }
  func.func @transform_1(%arg0: i32, %arg1: i32) -> (i32, i32, i32) {
    %c0_i32 = arith.constant 0 : i32
    %c0_i32_0 = arith.constant 0 : i32
    %c0_i32_1 = arith.constant 0 : i32
    return %arg0, %c0_i32, %c0_i32_0 : i32, i32, i32
  }
  func.func @transform_2(%arg0: i32, %arg1: i32) -> (i32, i32, i32) {
    %c0_i32 = arith.constant 0 : i32
    %c0_i32_0 = arith.constant 0 : i32
    return %arg0, %arg1, %c0_i32 : i32, i32, i32
  }
  func.func @transform_3(%arg0: i32, %arg1: i32) -> (i32, i32) {
    %c0_i32 = arith.constant 0 : i32
    %c0_i32_0 = arith.constant 0 : i32
    %c0_i32_1 = arith.constant 0 : i32
    return %c0_i32, %c0_i32_0 : i32, i32
  }
  func.func @transform_4(%arg0: i32, %arg1: i32) -> (i32, i32, i32) {
    %c0_i32 = arith.constant 0 : i32
    %c0_i32_0 = arith.constant 0 : i32
    return %arg0, %arg1, %c0_i32 : i32, i32, i32
  }
}

</mosaic_0001>

<bundles_post_ra>
// kernel: tpu_custom_call.1
= control target key start
LH: loop header
LB: loop body
LE: loop exit
PB: predicated region body
PF: predicated region fallthrough
CT: control target
= control target key end

     0   :  { %9 = vsyncpa [#allocation3], 0  ;;  %s1100_s0 = inlined_call_operand.hbm [shape: f32[2,8,128], index: 0, kind: input, shape index: {}]   ;;  %s1101_s1 = inlined_call_operand.hbm [shape: f32[2,8,128], index: 1, kind: input, shape index: {}]   ;;  %s1102_s2 = inlined_call_operand.vmem [shape: s8[2,8,8], index: 2, kind: input, shape index: {}]   ;;  %s1103_s3 = inlined_call_operand.vmem [shape: f32[4,128], index: 3, kind: input, shape index: {}]   ;;  %s1104_s4 = inlined_call_operand.hbm [shape: f32[2,8,128], index: 4, kind: output, shape index: {}]  }
   0x1   :  { %11 = vsyncpa [#allocation3 + $0x1], 0 }
   0x2   :  { %12 = vsyncpa [#allocation6], 0 }
   0x3   :  { %14 = vsyncpa [#allocation6 + $0x1], 0 }
   0x4   :  { %15 = vsyncpa [#allocation4], 0 }
   0x5   :  { %17 = vsyncpa [#allocation4 + $0x1], 0  ;;  %s864_s15 = smov 0   ;;  %s866_s16 = smov 0  }
   0x6   :  { %s868_s17 = smov 0   ;;  %s870_s18 = smov 0  }
   0x7   :  { %s872_s19 = smov 0   ;;  %s874_s20 = smov 0  }
   0x8 LB: > { %s578_s21 = sadd.s32 4294967295, %s832_s20   ;;  %s579_s22 = sadd.s32 4294967294, %s832_s20   ;;  %s832_s20 = sphi %s874_s20, %s23_s20   ;;  %s828_s19 = sphi %s872_s19, %s1124_s19   ;;  %s824_s18 = sphi %s870_s18, %s1123_s18   ;;  %s820_s17 = sphi %s868_s17, %s1122_s17   ;;  %s816_s16 = sphi %s866_s16, %s1121_s16   ;;  %s812_s15 = sphi %s864_s15, %s1120_s15  }
   0x9   : > { %s35_s23 = sadd.s32 1, %s828_s19  ;;  %s44_s24 = sadd.s32 1, %s820_s17 }
   0xa   : > { %p37_p0 = scmp.ge.s32.totalorder %s35_s23, 2  ;;  %p51_p1 = scmp.ne.s32.totalorder %s820_s17, %s816_s16 }
   0xb   : > { %p52_p2 = scmp.eq.s32.totalorder %s832_s20, 0  ;;  %p57_p3 = scmp.ne.s32.totalorder %s816_s16, %s812_s15 }
   0xc   : > { %s1126_s23 = smov (%p37_p0, %s35_s23), 0  ;;  %p58_p5 = scmp.eq.s32.totalorder %s578_s21, 0 }
   0xd   : > { %p905_p4 = por %p52_p2, %p51_p1  ;;  %s39_s26 = ssub.s32 %s828_s19, %s1126_s23 }
   0xe   : > { %p158_p6 = scmp.eq.s32.totalorder %s578_s21, 1  ;;  %p42_p7 = scmp.eq.s32.totalorder %s39_s26, 0 }
   0xf   : > { %p911_p8 = por %p58_p5, %p57_p3  ;;  %p164_p10 = scmp.eq.s32.totalorder %s579_s22, 1 }
  0x10   : > { %p915_p9 = por %p158_p6, %p51_p1  ;;  %p630_p13 = scmp.lt.s32.totalorder %s832_s20, 2 }
  0x11   : > { %s1108_s27 = scalar_select %p911_p8, 1, 0 }
  0x12   : > { %s1109_s28 = scalar_select %p915_p9, 1, 0 }
  0x13   : > { %s920_s29 = scalar_select %p42_p7, %s820_s17, %s44_s24  }
  0x14   : > { %p922_p11 = por %p164_p10, %p57_p3  ;;  %s929_s5 = sand.u32 1, %s820_s17  }
  0x15   : > { %s582_s6 = sshll.u32 %s929_s5, 3  ;;  %s583_s7 = sshll.u32 %s828_s19, 7 }
  0x16   : > { %s1110_s30 = scalar_select %p922_p11, 1, 0 }
  0x17   : > { %s938_s10 = scalar_lea.hbm %s1100_s0, %s583_s7  ;;  %s191_s11 = scalar_lea.vmem [#allocation2], %s582_s6 }
  0x18   : > { %s199_s12 = sshll.u32 %s191_s11, 4  ;;  %p946_p0 = pnand %p630_p13, %p905_p4  ;;  %s942_s12 = int_to_ptr.vmem [resolvable:$true] %s199_s12 }
  0x19   : > { %s188_s14 = scalar_lea.sflag [#allocation3], %s929_s5  ;;  %s686_s21 = scalar_lea.hbm %s938_s10, 128 }
  0x1a   : > { %p687_p3 = scmp.ne.s32.totalorder %s938_s10, %s686_s21  ;;  %p688_p5 = pneg %p946_p0 }
  0x1b   : > { %s691_s25 = scalar_lea.hbm %s1100_s0, 256  ;;  %p692_p4 = scmp.lt.u32.totalorder %s938_s10, %s1100_s0 }
  0x1c   : > { %p689_p6 = pnand %p688_p5, %p687_p3  ;;  %p693_p10 = scmp.lt.u32.totalorder %s691_s25, %s686_s21 }
  0x1d   : > { %p695_p12 = scmp.lt.u32.totalorder %s686_s21, %s938_s10 }
  0x1e   : > { %p690_p7 = pneg %p689_p6  ;;  %p694_p13 = por %p693_p10, %p692_p4 }
  0x20   : > { %p696_p1 = por %p695_p12, %p694_p13 }
  0x22   : > { %p697_p2 = pnand %p696_p1, %p690_p7 }
  0x24   : > { %700 = shalt.err (!%p697_p2)
}
  0x25   : > { %s701_s9 = scalar_lea.vmem %s942_s12, 128  ;;  %s834_s11 = smov [#allocation2]  }
  0x26   : > { %p702_p3 = scmp.ne.s32.totalorder %s942_s12, %s701_s9  ;;  %s706_s22 = sshll.u32 %s834_s11, 4  ;;  %s707_s22 = int_to_ptr.vmem [resolvable:$false] %s706_s22 }
  0x27   : > { %s708_s24 = scalar_lea.vmem %s707_s22, 256  ;;  %p709_p9 = scmp.lt.s32.totalorder %s942_s12, %s707_s22 }
  0x28   : > { %p704_p6 = pnand %p702_p3, %p688_p5  ;;  %p710_p4 = scmp.lt.s32.totalorder %s708_s24, %s701_s9 }
  0x2a   : > { %p705_p11 = pneg %p704_p6  ;;  %p711_p10 = por %p710_p4, %p709_p9 }
  0x2c   : > { %p712_p12 = pnand %p711_p10, %p705_p11 }
  0x2e   : > { %715 = shalt.err (!%p712_p12)
}
  0x2f   : > { %622 = dma.hbm_to_vmem [thread:$0]  (!%p946_p0), %s938_s10, 128, %s942_s12, %s188_s14  }
  0x30   : > { %p1112_p1 = scmp.lt.s32.totalorder %s832_s20, 3  ;;  %p1113_p2 = scmp.ge.s32.totalorder %s832_s20, 1 }
  0x31   : > { %s991_s8 = scalar_lea.hbm %s1101_s1, %s583_s7  ;;  %s210_s9 = scalar_lea.vmem [#allocation5], %s582_s6 }
  0x32   : > { %p982_p7 = pnand %p1113_p2, %p1112_p1  ;;  %s217_s11 = sshll.u32 %s210_s9, 4  ;;  %s218_s11 = int_to_ptr.vmem [resolvable:$true] %s217_s11 }
  0x33   : > { %s207_s10 = scalar_lea.sflag [#allocation6], %s929_s5  ;;  %s716_s12 = scalar_lea.hbm %s991_s8, 128 }
  0x34   : > { %s1114_s21 = scalar_select %p982_p7, 1, 0 }
  0x35   : > { %p717_p9 = scmp.ne.s32.totalorder %s991_s8, %s716_s12  ;;  %s721_s7 = scalar_lea.hbm %s1101_s1, 256 }
  0x36   : > { %p722_p3 = scmp.lt.u32.totalorder %s991_s8, %s1101_s1  ;;  %p723_p6 = scmp.lt.u32.totalorder %s721_s7, %s716_s12 }
  0x37   : > { %p719_p11 = pnand %p717_p9, %p688_p5  ;;  %p725_p10 = scmp.lt.u32.totalorder %s716_s12, %s991_s8 }
  0x38   : > { %p724_p4 = por %p723_p6, %p722_p3 }
  0x39   : > { %p720_p13 = pneg %p719_p11 }
  0x3a   : > { %p726_p12 = por %p725_p10, %p724_p4 }
  0x3c   : > { %p727_p1 = pnand %p726_p12, %p720_p13 }
  0x3e   : > { %730 = shalt.err (!%p727_p1)
}
  0x3f   : > { %s731_s5 = scalar_lea.vmem %s218_s11, 128  ;;  %s835_s6 = smov [#allocation5]  }
  0x40   : > { %p732_p2 = scmp.ne.s32.totalorder %s218_s11, %s731_s5  ;;  %s736_s26 = sshll.u32 %s835_s6, 4  ;;  %s737_s26 = int_to_ptr.vmem [resolvable:$false] %s736_s26 }
  0x41   : > { %s738_s9 = scalar_lea.vmem %s737_s26, 256  ;;  %p739_p8 = scmp.lt.s32.totalorder %s218_s11, %s737_s26 }
  0x42   : > { %p734_p9 = pnand %p732_p2, %p688_p5  ;;  %p740_p7 = scmp.lt.s32.totalorder %s738_s9, %s731_s5 }
  0x44   : > { %p735_p11 = pneg %p734_p9  ;;  %p741_p3 = por %p740_p7, %p739_p8 }
  0x46   : > { %p742_p6 = pnand %p741_p3, %p735_p11 }
  0x48   : > { %745 = shalt.err (!%p742_p6)
}
  0x49   : > { %625 = dma.hbm_to_vmem [thread:$0]  (!%p946_p0), %s991_s8, 128, %s218_s11, %s207_s10  }
  0x4a   : > { %p1115_p13 = scmp.ne.s32.totalorder %s1114_s21, 0 }
  0x4b   : > { %s1018_s12 = sand.u32 (!%p1115_p13), 1, %s816_s16   ;;  %p1116_p8 = scmp.ne.s32.totalorder (!%p1115_p13), %s1108_s27, 0 }
  0x4c   : > { %236 = sbr.rel (%p1115_p13) target bundleno = 708 (0x2c4), region = 36  ;;  %s1021_s14 = sshll.u32 (!%p1115_p13), %s1018_s12, 3 }
  0x4d   : > { %s239_s22 = scalar_lea.sflag (!%p1115_p13), [#allocation3], %s1018_s12  ;;  %s242_s7 = scalar_lea.vmem (!%p1115_p13), [#allocation2], %s1021_s14 }
  0x53   : > { %799 = dma.done.wait (%p1116_p8), %s239_s22, 128  }
  0x54   : > { %801 = vsyncadd (%p1116_p8), %s239_s22, 4294967168  ;;  %s248_s13 = scalar_lea.sflag [#allocation6], %s1018_s12  ;;  %s251_s21 = scalar_lea.vmem [#allocation5], %s1021_s14 }
  0x55   : > { %803 = dma.done.wait (%p1116_p8), %s248_s13, 128  }
  0x56   : > { %805 = vsyncadd (%p1116_p8), %s248_s13, 4294967168  ;;  %v302_v0 = vlaneseq  ;;  %v300_v6 = vld [vmem:[%s251_s21] sm:$0xff]  ;;  %v296_v7 = vld [vmem:[%s242_s7] sm:$0xff]  ;;  %p288_p0 = scmp.lt.s32.totalorder %s824_s18, 1  ;;  %vm384_vm5 = vcmask 64512   ;;  %vm398_vm6 = vcmask 1043456  }
  0x57   : > { %v297_v8 = vld [vmem:[%s1103_s3] sm:$0xf]  ;;  %v301_v9 = vpack.c.bf16 %v300_v6, %v300_v6  ;;  %v836_v33 = vmov 0.0   ;;  %vm837_vm7 = vmmov 0   ;;  %s593_s6 = sshll.u32 %s824_s18, 7  ;;  %s287_s26 = scalar_lea.vmem [#allocation7], %s1021_s14 }
  0x58   : > { %v303_v1 = vshrl.u32 %v302_v0, 7  ;;  %s289_s27 = scalar_select %p288_p0, %s824_s18, 1  ;;  %607 = vmatprep.subr.bf16.mxu1 %v836_v33  ;;  %609 = vmatprep.mubr.msk.bf16.mxu1 %vm837_vm7, %v836_v33 }
  0x59   : > { %601 = vmatprep.subr.bf16.mxu0 %v301_v9  ;;  %v400_v34 = vsel %vm398_vm6, %v301_v9, 0  ;;  %s460_s9 = sshll.u32 %s287_s26, 4  ;;  %s1051_s13 = scalar_lea.hbm %s1104_s4, %s593_s6  ;;  %s1053_s9 = int_to_ptr.vmem [resolvable:$true] %s460_s9 }
  0x5a   : > { %v304_v2 = vsub.s32 0, %v303_v1  ;;  %v309_v3 = vsub.s32 1, %v303_v1  ;;  %v314_v4 = vsub.s32 2, %v303_v1  ;;  %v319_v5 = vsub.s32 3, %v303_v1  ;;  %602 = vmatpush3.bf16.xpose.msra.mxu0 %v301_v9  ;;  %s590_s10 = sshll.u32 %s289_s27, 1  ;;  %608 = vmatpush3.bf16.msra.mxu1 %v400_v34  ;;  %s446_s18 = scalar_lea.sflag [#allocation4], %s1018_s12 }
  0x5b   : > { %s294_s5 = scalar_lea.vmem %s1102_s2, %s590_s10  ;;  %s746_s14 = scalar_lea.vmem %s1053_s9, 128 }
  0x5c   : > { %v305_v10 = vrot.slane %v297_v8, %v304_v2  ;;  %v310_v11 = vrot.slane %v297_v8, %v309_v3  ;;  %v315_v12 = vrot.slane %v297_v8, %v314_v4  ;;  %v320_v13 = vrot.slane %v297_v8, %v319_v5  ;;  %v298_v20 = vld [vmem:[%s294_s5] sm:$0x3]  ;;  %p747_p5 = scmp.ne.s32.totalorder %s1053_s9, %s746_s14  ;;  %p1117_p7 = scmp.ne.s32.totalorder %s1109_s28, 0 }
  0x5d   : > { %v299_v21 = vunpack.c.0.s8 %v298_v20  ;;  %s838_s21 = smov [#allocation7]  }
  0x5e   : > { %v306_v14 = vmul.f32 %v305_v10, %v296_v7  ;;  %v311_v15 = vmul.f32 %v310_v11, %v296_v7  ;;  %v316_v16 = vmul.f32 %v315_v12, %v296_v7  ;;  %v321_v17 = vmul.f32 %v320_v13, %v296_v7  ;;  %p748_p4 = pnand %p747_p5, %p1117_p7  ;;  %s750_s8 = sshll.u32 %s838_s21, 4  ;;  %s751_s8 = int_to_ptr.vmem [resolvable:$false] %s750_s8 }
  0x5f   : > { %vm373_vm0 = vcmp.eq.s32.totalorder %v299_v21, 1  ;;  %vm375_vm1 = vcmp.eq.s32.totalorder %v299_v21, 2  ;;  %vm377_vm2 = vcmp.eq.s32.totalorder %v299_v21, 3  ;;  %vm379_vm3 = vcmp.eq.s32.totalorder %v299_v21, 4  ;;  %s752_s11 = scalar_lea.vmem %s751_s8, 256  ;;  %p753_p12 = scmp.lt.s32.totalorder %s1053_s9, %s751_s8 }
  0x60   : > { %v322_v18 = vpack.c.bf16 %v311_v15, %v306_v14  ;;  %v323_v19 = vpack.c.bf16 %v321_v17, %v316_v16  ;;  %p749_p10 = pneg %p748_p4  ;;  %p754_p1 = scmp.lt.s32.totalorder %s752_s11, %s746_s14 }
  0x62   : > { %603 = vmatprep.mubr.bf16.mxu0 %v322_v18  ;;  %p755_p2 = por %p754_p1, %p753_p12 }
  0x63   : > { %604 = vmatmul.mubr.bf16.vlgmr.msra.gmra.mrb[0].mxu0 %v323_v19 }
  0x64   : > { %p756_p9 = pnand %p755_p2, %p749_p10 }
 0x136   : > { %v605_v22 = vpop.f32.mrb[0].mxu0 }
 0x137   : > { %v358_v23 = vpop.f32.mrb[1].mxu0 }
 0x138   : > { %v374_v24 = vsel %vm373_vm0, %v358_v23, -9e+15  ;;  %v606_v25 = vpop.f32.mrb[2].mxu0 }
 0x139   : > { %v361_v26 = vpop.f32.mrb[3].mxu0 }
 0x13a   : > { %v376_v27 = vsel %vm375_vm1, %v361_v26, %v374_v24 }
 0x13b   : > { %v378_v28 = vsel %vm377_vm2, %v605_v22, %v376_v27 }
 0x13c   : > { %v380_v29 = vsel %vm379_vm3, %v606_v25, %v378_v28 }
 0x13d   : > { %vm381_vm4 = vcmp.gt.f32.partialorder %v380_v29, 0.0  ;;  %v382_v30 = vmul.f32 0.2, %v380_v29 }
 0x13f   : > { %v383_v31 = vsel %vm381_vm4, %v380_v29, %v382_v30 }
 0x140   : > { %v385_v32 = vsel %vm384_vm5, %v383_v31, -inf }
 0x141   : > { %386 = vmax.xlane.f32.xlu0 %v385_v32 }
 0x1ce   : > { %v387_v35 = vpop.xlane.xlu0 %386 }
 0x1cf   : > { %v388_v36 = vsub.f32 %v383_v31, %v387_v35 }
 0x1d1   : > { %v389_v37 = vmul.f32 1.442695, %v388_v36 }
 0x1d3   : > { %682 = vpow2.f32 %v389_v37 }
 0x1dd   : > { %v683_v38 = vpop.eup %682 }
 0x1de   : > { %v391_v39 = vsel %vm384_vm5, %v683_v38, 0.0  ;;  %v394_v40 = vpack.c.bf16 %v683_v38, %v683_v38 }
 0x1df   : > { %392 = vadd.xlane.f32.xlu0 %v391_v39 }
 0x1e0   : > { %610 = vmatmul.mubr.msk.bf16.vlgmr.msra.gmra.mrb[0].mxu1 %vm384_vm5, %v394_v40 }
 0x26c   : > { %v393_v41 = vpop.xlane.xlu0 %392 }
 0x26d   : > { %684 = vrcp.f32 %v393_v41 }
 0x277   : > { %v685_v42 = vpop.eup %684 }
 0x2b3   : > { %v436_v43 = vpop.f32.mrb[0].mxu1 }
 0x2b4   : > { %v443_v44 = vmul.f32 %v685_v42, %v436_v43  ;;  %v611_v45 = vpop.f32.mrb[1].mxu1 }
 0x2b5   : > { %v439_v46 = vpop.f32.mrb[2].mxu1 }
 0x2b6   : > { %444 = vst [vmem:[%s287_s26] sm:$0xff] %v443_v44  ;;  %v612_v47 = vpop.f32.mrb[3].mxu1 }
 0x2b7   : > { %759 = shalt.err (!%p756_p9)
}
 0x2b8   : > { %s760_s12 = scalar_lea.hbm %s1051_s13, 128  ;;  %s764_s24 = scalar_lea.hbm %s1104_s4, 256 }
 0x2b9   : > { %p761_p11 = scmp.ne.s32.totalorder %s1051_s13, %s760_s12  ;;  %p765_p13 = scmp.lt.u32.totalorder %s1051_s13, %s1104_s4 }
 0x2ba   : > { %p766_p8 = scmp.lt.u32.totalorder %s764_s24, %s760_s12  ;;  %p768_p5 = scmp.lt.u32.totalorder %s760_s12, %s1051_s13 }
 0x2bb   : > { %p762_p3 = pnand %p761_p11, %p1117_p7 }
 0x2bc   : > { %p767_p0 = por %p766_p8, %p765_p13 }
 0x2bd   : > { %p763_p6 = pneg %p762_p3 }
 0x2be   : > { %p769_p4 = por %p768_p5, %p767_p0 }
 0x2c0   : > { %p770_p10 = pnand %p769_p4, %p763_p6 }
 0x2c2   : > { %773 = shalt.err (!%p770_p10)
}
 0x2c3   : > { %617 = dma.vmem_to_hbm [thread:$0]  (%p1117_p7), %s1053_s9, 128, %s1051_s13, %s446_s18  }
 0x2c4 PF: > { %s472_s6 = sand.u32 1, %s812_s15   ;;  %p1118_p12 = scmp.ne.s32.totalorder %s1110_s30, 0 }
 0x2c5   : > { %p1119_p1 = scmp.ge.s32.totalorder %s832_s20, 2  ;;  %s473_s26 = scalar_lea.sflag [#allocation4], %s472_s6 }
 0x2c7   : > { %p627_p2 = pnand %p1119_p1, %p1118_p12 }
 0x2c9   : > { %807 = dma.done.wait (!%p627_p2), %s473_s26, 128  }
 0x2ca   : > { %809 = vsyncadd (!%p627_p2), %s473_s26, 4294967168  ;;  %s23_s20 = sadd.s32 1, %s832_s20   ;;  %s1120_s15 = smov %s816_s16 }
 0x2cb   : > { %p20_p9 = scmp.ge.s32.totalorder %s23_s20, 4   ;;  %s1121_s16 = smov %s820_s17 }
 0x2cc   : > { %s1122_s17 = smov %s920_s29  ;;  %s1123_s18 = smov %s828_s19 }
 0x2cd   : > { %s1124_s19 = smov %s1126_s23  ;;  %22 = sbr.rel (!%p20_p9) target bundleno = 8 (0x8), region = 97 }
 0x2d4   :  { %478 = vsyncpa [#allocation3], 1 }
 0x2d5   :  { %480 = vsyncpa [#allocation3 + $0x1], 1 }
 0x2d6   :  { %481 = vsyncpa [#allocation6], 1 }
 0x2d7   :  { %483 = vsyncpa [#allocation6 + $0x1], 1 }
 0x2d8   :  { %484 = vsyncpa [#allocation4], 1 }
 0x2d9   :  { %486 = vsyncpa [#allocation4 + $0x1], 1 }

</bundles_post_ra>
